<compile_context>
chip_gen: v6e
topology: v6e:2x2x1
jax: 0.10.0
libtpu: 0.0.40
codegen_flags: <defaults>
</compile_context>

<pallas_src>
import functools

import jax
import jax.numpy as jnp
from jax import lax
from jax.experimental import pallas as pl
from jax.experimental.pallas import tpu as pltpu

LN_EPS = 1e-5                     # torch.nn.LayerNorm default
COMPUTE_DTYPE = jnp.bfloat16      # MXU-native on v5e / v6e / v7x
_MIB = 1 << 20


# ----------------------------- helpers ------------------------------------- #

def _round_up(x, m):
    return ((x + m - 1) // m) * m


@functools.lru_cache(maxsize=1)
def _vmem_cap_bytes():
    try:
        cap = int(getattr(pltpu.get_tpu_info(), "vmem_capacity_bytes"))
        if cap > 0:
            return cap
    except Exception:
        pass
    return 64 * _MIB                      # conservative (v7x per-TC VMEM)


def _vmem_limit(working_set_bytes):
    # working set + headroom, clamped per generation: ~56 MiB on v7x (64 MiB
    # physical per TC), up to ~100 MiB on v5e/v6e (128 MiB).
    upper = min(_vmem_cap_bytes() - 8 * _MIB, 100 * _MIB)
    return int(min(max(working_set_bytes + 4 * _MIB, 32 * _MIB), upper))


def _row_tile(m_rows):
    # fatter row tiles on 128 MiB chips (v5e/v6e), 256 on v7x; always a
    # multiple of 8 sublanes and never larger than needed.
    target = 512 if _vmem_cap_bytes() >= 96 * _MIB else 256
    return min(target, _round_up(m_rows, 8))


def _divisor_chunk(total, target=512, quantum=128):
    # largest 128-multiple divisor of `total` not exceeding `target`
    # (falls back to `total` so contraction axes are never ragged).
    if total <= target:
        return total
    c = (target // quantum) * quantum
    while c >= quantum:
        if total % c == 0:
            return c
        c -= quantum
    return total


def _qkv_col_chunk(d, d3, itemsize):
    budget = max(8 * _MIB, _vmem_cap_bytes() // 3)
    if d * d3 * itemsize <= budget:
        return d3                          # small enough to keep resident
    return _divisor_chunk(d3)


def _ffn_hidden_chunk(d, hidden, tm, itemsize):
    budget = max(8 * _MIB, _vmem_cap_bytes() // 3)
    need = 2 * d * hidden * itemsize + tm * hidden * 4
    if need <= budget:
        return hidden                      # residents + f32 intermediate fit
    return _divisor_chunk(hidden)


def _maybe_resident(shape, index_map=None, varies=False):
    # Constant-index blocks are single-buffered (no wasted double-buffer VMEM);
    # blocks whose index varies over the grid use the normal pipelined spec.
    nd = len(shape)
    if varies:
        return pl.BlockSpec(shape, index_map)
    return pl.BlockSpec(shape, lambda *_: (0,) * nd,
                        pipeline_mode=pl.Buffered(1))


def _layernorm_f32(x, gamma, beta):
    gamma = gamma.astype(jnp.float32)
    beta = beta.astype(jnp.float32)
    mu = jnp.mean(x, axis=-1, keepdims=True)
    xc = x - mu
    var = jnp.mean(xc * xc, axis=-1, keepdims=True)
    return xc * lax.rsqrt(var + LN_EPS) * gamma + beta


# ----------------------------- kernels ------------------------------------- #

def linear_kernel(x_ref, w_ref, b_ref, o_ref):
    # patch_to_embedding: x @ W + b
    acc = jnp.dot(x_ref[...], w_ref[...], preferred_element_type=jnp.float32)
    o_ref[...] = (acc + b_ref[...].astype(jnp.float32)).astype(o_ref.dtype)


def prenorm_qkv_kernel(x_ref, g_ref, b_ref, w_ref, o_ref, ln_sc):
    # qkv_cols = LayerNorm(x) @ W_qkv[:, j-chunk]   (to_qkv has no bias)
    # LN is computed once per row block and cached for all column chunks.
    @pl.when(pl.program_id(1) == 0)
    def _():
        x = x_ref[...].astype(jnp.float32)
        ln_sc[...] = _layernorm_f32(x, g_ref[...], b_ref[...]).astype(ln_sc.dtype)

    o_ref[...] = jnp.dot(ln_sc[...], w_ref[...],
                         preferred_element_type=jnp.float32).astype(o_ref.dtype)


def attention_proj_kernel(qkv_ref, res_ref, wo_ref, bo_ref, o_ref, *, heads, dim):
    # Per batch tile: for each head, softmax(q k^T) v  (scale pre-folded into
    # W_q by the wrapper), concat heads along lanes, then fused epilogue
    # out = concat @ W_out + b_out + residual  -> lane-dense (seq, dim) store.
    dh = dim // heads
    outs = []
    for h in range(heads):
        q = qkv_ref[:, :, h * dh:(h + 1) * dh]
        k = qkv_ref[:, :, dim + h * dh:dim + (h + 1) * dh]
        v = qkv_ref[:, :, 2 * dim + h * dh:2 * dim + (h + 1) * dh]
        s = jnp.einsum('bnd,bmd->bnm', q, k, preferred_element_type=jnp.float32)
        s = s - jnp.max(s, axis=-1, keepdims=True)
        p = jnp.exp(s)
        p = p * pl.reciprocal(jnp.sum(p, axis=-1, keepdims=True), approx=True)
        outs.append(jnp.einsum('bnm,bmd->bnd', p.astype(v.dtype), v,
                               preferred_element_type=jnp.float32))
    cat = jnp.concatenate(outs, axis=-1) if heads > 1 else outs[0]  # (tb, n, dim) f32

    bias = bo_ref[...].astype(jnp.float32)            # (1, dim)
    for bi in range(o_ref.shape[0]):                   # static unroll over batch tile
        proj = jnp.dot(cat[bi].astype(wo_ref.dtype), wo_ref[...],
                       preferred_element_type=jnp.float32)
        o_ref[bi] = (proj + bias + res_ref[bi].astype(jnp.float32)).astype(o_ref.dtype)


def prenorm_ffn_kernel(x_ref, g_ref, be_ref, w1_ref, b1_ref, w2_ref, b2_ref,
                       o_ref, ln_sc, acc_sc):
    # y = ReLU(LN(x) @ W1 + b1) @ W2 + b2 + x, with the hidden axis chunked over
    # the second grid axis and accumulated into an f32 VMEM scratch.
    h_idx = pl.program_id(1)

    @pl.when(h_idx == 0)
    def _():
        x = x_ref[...].astype(jnp.float32)
        ln_sc[...] = _layernorm_f32(x, g_ref[...], be_ref[...]).astype(ln_sc.dtype)
        acc_sc[...] = jnp.zeros_like(acc_sc)

    h = jnp.dot(ln_sc[...], w1_ref[...], preferred_element_type=jnp.float32)
    h = jnp.maximum(h + b1_ref[...].astype(jnp.float32), 0.0)
    acc_sc[...] += jnp.dot(h.astype(w2_ref.dtype), w2_ref[...],
                           preferred_element_type=jnp.float32)

    @pl.when(h_idx == pl.num_programs(1) - 1)
    def _():
        out = acc_sc[...] + b2_ref[...].astype(jnp.float32) + x_ref[...].astype(jnp.float32)
        o_ref[...] = out.astype(o_ref.dtype)


# ----------------------------- wrappers ------------------------------------ #

def _linear(x2d, w, b):
    m, d_in = x2d.shape
    d_out = w.shape[1]
    tm = _row_tile(m)
    work = (w.size * w.dtype.itemsize + b.size * b.dtype.itemsize
            + 2 * tm * (d_in + d_out) * x2d.dtype.itemsize
            + 4 * tm * d_out)
    return pl.pallas_call(
        linear_kernel,
        out_shape=jax.ShapeDtypeStruct((m, d_out), x2d.dtype),
        grid_spec=pltpu.PrefetchScalarGridSpec(
            num_scalar_prefetch=0, grid=(pl.cdiv(m, tm),),
            in_specs=[pl.BlockSpec((tm, d_in), lambda i: (i, 0)),
                      _maybe_resident((d_in, d_out)),
                      _maybe_resident((1, d_out))],
            out_specs=pl.BlockSpec((tm, d_out), lambda i: (i, 0))),
        compiler_params=pltpu.CompilerParams(
            dimension_semantics=("parallel",),
            vmem_limit_bytes=_vmem_limit(work)),
    )(x2d, w, b)


def _prenorm_qkv(x2d, gamma, beta, w_qkv):
    m, d = x2d.shape
    d3 = w_qkv.shape[1]
    tm = _row_tile(m)
    tn = _qkv_col_chunk(d, d3, w_qkv.dtype.itemsize)
    n_j = d3 // tn
    w_varies = n_j > 1

    work = (gamma.size * 4 + beta.size * 4
            + (2 if w_varies else 1) * d * tn * w_qkv.dtype.itemsize
            + 2 * tm * d * x2d.dtype.itemsize
            + 2 * tm * tn * x2d.dtype.itemsize
            + tm * d * x2d.dtype.itemsize          # ln scratch
            + 4 * tm * tn)                         # f32 matmul result

    return pl.pallas_call(
        prenorm_qkv_kernel,
        out_shape=jax.ShapeDtypeStruct((m, d3), x2d.dtype),
        grid_spec=pltpu.PrefetchScalarGridSpec(
            num_scalar_prefetch=0, grid=(pl.cdiv(m, tm), n_j),
            in_specs=[pl.BlockSpec((tm, d), lambda i, j: (i, 0)),
                      _maybe_resident((1, d)),
                      _maybe_resident((1, d)),
                      _maybe_resident((d, tn), lambda i, j: (0, j), varies=w_varies)],
            out_specs=pl.BlockSpec((tm, tn), lambda i, j: (i, j)),
            scratch_shapes=[pltpu.VMEM((tm, d), x2d.dtype)]),
        compiler_params=pltpu.CompilerParams(
            dimension_semantics=("parallel", "arbitrary"),
            vmem_limit_bytes=_vmem_limit(work)),
    )(x2d, gamma, beta, w_qkv)


def _attention_proj(qkv3, res3, w_out, b_out, *, heads):
    b, seq, d3 = qkv3.shape
    dim = d3 // 3
    # bound the per-step f32 score / per-head working set (important on v7x)
    per_batch = 8 * seq * seq + 12 * seq * dim
    budget = max(4 * _MIB, _vmem_cap_bytes() // 3)
    tb = int(max(1, min(b, budget // max(per_batch, 1), 8)))

    work = (w_out.size * w_out.dtype.itemsize + b_out.size * b_out.dtype.itemsize
            + 2 * tb * seq * (d3 + 2 * dim) * qkv3.dtype.itemsize
            + tb * per_batch)

    kernel = functools.partial(attention_proj_kernel, heads=heads, dim=dim)
    return pl.pallas_call(
        kernel,
        out_shape=jax.ShapeDtypeStruct((b, seq, dim), qkv3.dtype),
        grid_spec=pltpu.PrefetchScalarGridSpec(
            num_scalar_prefetch=0, grid=(pl.cdiv(b, tb),),
            in_specs=[pl.BlockSpec((tb, seq, d3), lambda i: (i, 0, 0)),
                      pl.BlockSpec((tb, seq, dim), lambda i: (i, 0, 0)),
                      _maybe_resident((dim, dim)),
                      _maybe_resident((1, dim))],
            out_specs=pl.BlockSpec((tb, seq, dim), lambda i: (i, 0, 0))),
        compiler_params=pltpu.CompilerParams(
            dimension_semantics=("parallel",),
            vmem_limit_bytes=_vmem_limit(work)),
    )(qkv3, res3, w_out, b_out)


def _prenorm_ffn_residual(x2d, gamma, beta, w1, b1, w2, b2):
    m, d = x2d.shape
    hidden = w1.shape[1]
    tm = _row_tile(m)
    th = _ffn_hidden_chunk(d, hidden, tm, w1.dtype.itemsize)
    n_h = hidden // th
    w_varies = n_h > 1
    bufs = 2 if w_varies else 1

    work = ((gamma.size + beta.size + b2.size) * 4
            + bufs * 2 * d * th * w1.dtype.itemsize
            + bufs * th * 4
            + 2 * 2 * tm * d * x2d.dtype.itemsize          # x + out tiles, dbl-buffered
            + tm * d * (x2d.dtype.itemsize + 4)            # ln + acc scratch
            + 4 * tm * th)                                 # f32 hidden intermediate

    return pl.pallas_call(
        prenorm_ffn_kernel,
        out_shape=jax.ShapeDtypeStruct((m, d), x2d.dtype),
        grid_spec=pltpu.PrefetchScalarGridSpec(
            num_scalar_prefetch=0, grid=(pl.cdiv(m, tm), n_h),
            in_specs=[pl.BlockSpec((tm, d), lambda i, h: (i, 0)),
                      _maybe_resident((1, d)),
                      _maybe_resident((1, d)),
                      _maybe_resident((d, th), lambda i, h: (0, h), varies=w_varies),
                      _maybe_resident((1, th), lambda i, h: (0, h), varies=w_varies),
                      _maybe_resident((th, d), lambda i, h: (h, 0), varies=w_varies),
                      _maybe_resident((1, d))],
            out_specs=pl.BlockSpec((tm, d), lambda i, h: (i, 0)),
            scratch_shapes=[pltpu.VMEM((tm, d), x2d.dtype),
                            pltpu.VMEM((tm, d), jnp.float32)]),
        compiler_params=pltpu.CompilerParams(
            dimension_semantics=("parallel", "arbitrary"),
            vmem_limit_bytes=_vmem_limit(work)),
    )(x2d, gamma, beta, w1, b1, w2, b2)


# --------------------------- full model ------------------------------------ #

def init_params(key, *, patch_size, dim, depth, heads, mlp_dim, channels=1):
    assert dim % heads == 0
    patch_dim = channels * patch_size
    keys = iter(jax.random.split(key, 8 + depth * 12))

    def uniform(k, shape, fan_in):
        lim = 1.0 / (fan_in ** 0.5)
        return jax.random.uniform(k, shape, jnp.float32, -lim, lim)

    params = {
        'patch_w': uniform(next(keys), (patch_dim, dim), patch_dim),
        'patch_b': uniform(next(keys), (1, dim), patch_dim),
        'c_token': jax.random.normal(next(keys), (1, 1, dim), jnp.float32),
        'layers': [],
    }
    for _ in range(depth):
        params['layers'].append({
            'ln1_g': 1.0 + 0.1 * jax.random.normal(next(keys), (1, dim), jnp.float32),
            'ln1_b': 0.1 * jax.random.normal(next(keys), (1, dim), jnp.float32),
            'w_qkv': uniform(next(keys), (dim, 3 * dim), dim),
            'w_out': uniform(next(keys), (dim, dim), dim),
            'b_out': uniform(next(keys), (1, dim), dim),
            'ln2_g': 1.0 + 0.1 * jax.random.normal(next(keys), (1, dim), jnp.float32),
            'ln2_b': 0.1 * jax.random.normal(next(keys), (1, dim), jnp.float32),
            'w1': uniform(next(keys), (dim, mlp_dim), dim),
            'b1': uniform(next(keys), (1, mlp_dim), dim),
            'w2': uniform(next(keys), (mlp_dim, dim), mlp_dim),
            'b2': uniform(next(keys), (1, dim), mlp_dim),
        })
    return params


def seq_transformer_forward(params, forward_seq, *, heads,
                            compute_dtype=COMPUTE_DTYPE):
    b, n, patch_dim = forward_seq.shape
    dim = params['patch_w'].shape[1]
    scale = float(dim) ** -0.5          # module uses full dim, not head dim
    cd = compute_dtype

    # patch_to_embedding (ragged tail handled by the cdiv grid — no pad/slice)
    x2d = _linear(forward_seq.reshape(b * n, patch_dim).astype(cd),
                  params['patch_w'].astype(cd), params['patch_b'])
    x = x2d.reshape(b, n, dim)

    # prepend class token
    c_tok = jnp.broadcast_to(params['c_token'].astype(cd), (b, 1, dim))
    x = jnp.concatenate([c_tok, x], axis=1)
    seq = n + 1
    rows = x.reshape(b * seq, dim)      # kept flat (never padded / sliced)

    for layer in params['layers']:
        # fold the softmax scale into W_q once, outside all kernels
        w_qkv = layer['w_qkv'].astype(jnp.float32)
        w_qkv = w_qkv.at[:, :dim].multiply(scale).astype(cd)

        # --- Residual(PreNorm(Attention)) : LN -> QKV, then fused
        #     per-head softmax(qk^T)v -> concat -> @W_out + b_out + residual ---
        qkv = _prenorm_qkv(rows, layer['ln1_g'], layer['ln1_b'], w_qkv)
        rows = _attention_proj(qkv.reshape(b, seq, 3 * dim),
                               rows.reshape(b, seq, dim),
                               layer['w_out'].astype(cd), layer['b_out'],
                               heads=heads).reshape(b * seq, dim)

        # --- Residual(PreNorm(FeedForward)), hidden axis chunked in-kernel ---
        rows = _prenorm_ffn_residual(rows, layer['ln2_g'], layer['ln2_b'],
                                     layer['w1'].astype(cd), layer['b1'],
                                     layer['w2'].astype(cd), layer['b2'])

    return rows.reshape(b, seq, dim)[:, 0]     # to_c_token = nn.Identity


# --------------------------- pure-JAX reference ----------------------------- #

def reference_forward(params, forward_seq, *, heads, compute_dtype=COMPUTE_DTYPE):
    f32 = jnp.float32

    def cast(w):  # same bf16-rounded weights the kernel path sees, f32 math
        return w.astype(compute_dtype).astype(f32)

    def ln(z, g, be):
        mu = z.mean(-1, keepdims=True)
        var = ((z - mu) ** 2).mean(-1, keepdims=True)
        return (z - mu) / jnp.sqrt(var + LN_EPS) * g[0] + be[0]

    x = forward_seq.astype(compute_dtype).astype(f32)
    x = x @ cast(params['patch_w']) + params['patch_b'][0]
    b, n, dim = x.shape
    x = jnp.concatenate([jnp.broadcast_to(cast(params['c_token']), (b, 1, dim)), x], axis=1)
    seq, dh, scale = n + 1, dim // heads, float(dim) ** -0.5

    for layer in params['layers']:
        y = ln(x, layer['ln1_g'], layer['ln1_b'])
        q, k, v = jnp.split(y @ cast(layer['w_qkv']), 3, axis=-1)
        split = lambda t: t.reshape(b, seq, heads, dh).transpose(0, 2, 1, 3)
        q, k, v = split(q), split(k), split(v)
        dots = jnp.einsum('bhid,bhjd->bhij', q, k) * scale
        attn = jax.nn.softmax(dots, axis=-1)
        out = jnp.einsum('bhij,bhjd->bhid', attn, v)
        out = out.transpose(0, 2, 1, 3).reshape(b, seq, dim)
        x = out @ cast(layer['w_out']) + layer['b_out'][0] + x
        y = ln(x, layer['ln2_g'], layer['ln2_b'])
        h = jnp.maximum(y @ cast(layer['w1']) + layer['b1'][0], 0.0)
        x = h @ cast(layer['w2']) + layer['b2'][0] + x
    return x[:, 0]


# ------------------------------- demo --------------------------------------- #

if __name__ == "__main__":
    # dh = dim // heads = 128 keeps every in-kernel head slice lane-aligned
    # (the kernels are still correct for other head dims).
    patch_size, dim, depth, heads, mlp_dim = 16, 256, 2, 2, 512
    channels, batch, seq_len = 1, 2, 8

    key = jax.random.PRNGKey(0)
    kp, kx = jax.random.split(key)
    params = init_params(kp, patch_size=patch_size, dim=dim, depth=depth,
                         heads=heads, mlp_dim=mlp_dim, channels=channels)
    forward_seq = jax.random.normal(kx, (batch, seq_len, channels * patch_size),
                                    dtype=jnp.float32)

    c_t = seq_transformer_forward(params, forward_seq, heads=heads)
    c_t = jax.block_until_ready(c_t)
    assert c_t.shape == (batch, dim)

    ref = reference_forward(params, forward_seq, heads=heads)
    err = float(jnp.max(jnp.abs(c_t.astype(jnp.float32) - ref)))
    # bf16 weights/activations + approx reciprocal vs f32 reference -> loose tolerance.
    assert jnp.allclose(c_t.astype(jnp.float32), ref, atol=1e-1, rtol=5e-2), \
        f"mismatch vs reference (max abs err {err})"

    print("KERNEL_OK")
</pallas_src>

<mosaic_0001>
module attributes {stable_mosaic.version = 11 : i64} {
  func.func @linear_kernel(%arg0: i32, %arg1: memref<16x16xbf16, #tpu.memory_space<vmem>>, %arg2: memref<16x256xbf16, #tpu.memory_space<vmem>>, %arg3: memref<1x256xf32, #tpu.memory_space<vmem>>, %arg4: memref<16x256xbf16, #tpu.memory_space<vmem>>) attributes {dimension_semantics = [#tpu.dimension_semantics<parallel>], iteration_bounds = array<i64: 1>, scalar_prefetch = 0 : i64, scratch_operands = 0 : i64, tpu.core_type = #tpu.core_type<tc>, window_params = [{transform_indices = @transform_0, window_bounds = array<i64: 16, 16>}, {pipeline_mode = #tpu.pipeline_mode<synchronous>, transform_indices = @transform_1, window_bounds = array<i64: 16, 256>}, {pipeline_mode = #tpu.pipeline_mode<synchronous>, transform_indices = @transform_2, window_bounds = array<i64: 1, 256>}, {transform_indices = @transform_3, window_bounds = array<i64: 16, 256>}]} {
    %c0 = arith.constant 0 : index
    %c0_0 = arith.constant 0 : index
    %0 = vector.load %arg1[%c0, %c0_0] : memref<16x16xbf16, #tpu.memory_space<vmem>>, vector<16x16xbf16>
    %c0_1 = arith.constant 0 : index
    %c0_2 = arith.constant 0 : index
    %1 = vector.load %arg2[%c0_1, %c0_2] : memref<16x256xbf16, #tpu.memory_space<vmem>>, vector<16x256xbf16>
    %cst = arith.constant dense<0.000000e+00> : vector<16x256xf32>
    %2 = tpu.matmul %0, %1, %cst {dimension_numbers = #tpu.dot_dimension_numbers<[1], [0], [0], [1], [0, 0, 1, 1], [], []>} : vector<16x16xbf16>, vector<16x256xbf16>, vector<16x256xf32> -> vector<16x256xf32>
    %c0_3 = arith.constant 0 : index
    %c0_4 = arith.constant 0 : index
    %3 = vector.load %arg3[%c0_3, %c0_4] : memref<1x256xf32, #tpu.memory_space<vmem>>, vector<1x256xf32>
    %4 = vector.broadcast %3 : vector<1x256xf32> to vector<16x256xf32>
    %5 = arith.addf %2, %4 : vector<16x256xf32>
    %6 = arith.truncf %5 : vector<16x256xf32> to vector<16x256xbf16>
    %c0_5 = arith.constant 0 : index
    %c0_6 = arith.constant 0 : index
    %7 = vector.load %arg4[%c0_5, %c0_6] : memref<16x256xbf16, #tpu.memory_space<vmem>>, vector<16x256xbf16>
    tpu.vector_store %arg4[%c0_5, %c0_6], %6 {strides = array<i32>} : memref<16x256xbf16, #tpu.memory_space<vmem>>, vector<16x256xbf16>,
    return
  }
  func.func @transform_0(%arg0: i32) -> (i32, i32) {
    %c0_i32 = arith.constant 0 : i32
    %c0_i32_0 = arith.constant 0 : i32
    return %arg0, %c0_i32 : i32, i32
  }
  func.func @transform_1(%arg0: i32) -> (i32, i32) {
    %c0_i32 = arith.constant 0 : i32
    %c0_i32_0 = arith.constant 0 : i32
    %c0_i32_1 = arith.constant 0 : i32
    return %c0_i32, %c0_i32_0 : i32, i32
  }
  func.func @transform_2(%arg0: i32) -> (i32, i32) {
    %c0_i32 = arith.constant 0 : i32
    %c0_i32_0 = arith.constant 0 : i32
    %c0_i32_1 = arith.constant 0 : i32
    return %c0_i32, %c0_i32_0 : i32, i32
  }
  func.func @transform_3(%arg0: i32) -> (i32, i32) {
    %c0_i32 = arith.constant 0 : i32
    %c0_i32_0 = arith.constant 0 : i32
    return %arg0, %c0_i32 : i32, i32
  }
}

</mosaic_0001>

<bundles_post_ra>
// kernel: tpu_custom_call.1
= control target key start
LH: loop header
LB: loop body
LE: loop exit
PB: predicated region body
PF: predicated region fallthrough
CT: control target
= control target key end

     0   :  { %8 = vsyncpa [#allocation3], 0  ;;  %s286_s0 = inlined_call_operand.hbm [shape: bf16[16,16], index: 0, kind: input, shape index: {}]   ;;  %s287_s1 = inlined_call_operand.hbm [shape: bf16[16,256], index: 1, kind: input, shape index: {}]   ;;  %s288_s2 = inlined_call_operand.vmem [shape: f32[1,256], index: 2, kind: input, shape index: {}]   ;;  %s289_s3 = inlined_call_operand.hbm [shape: bf16[16,256], index: 3, kind: output, shape index: {}]  }
   0x1   :  { %9 = vsyncpa [#allocation6], 0 }
   0x2   :  { %10 = vsyncpa [#allocation4], 0  ;;  %s240_s12 = smov [#allocation2]  }
   0x3   :  { %s16_s13 = sshll.u32 %s240_s12, 4  ;;  %s17_s13 = int_to_ptr.vmem [resolvable:$true] %s16_s13 }
   0x4   :  { %s182_s14 = scalar_lea.vmem %s17_s13, 128  ;;  %p187_p1 = scmp.lt.s32.totalorder %s17_s13, %s17_s13 }
   0x5   :  { %p183_p0 = scmp.ne.s32.totalorder %s17_s13, %s182_s14  ;;  %p188_p2 = scmp.lt.s32.totalorder %s182_s14, %s182_s14 }
   0x7   :  { %p189_p3 = por %p188_p2, %p187_p1 }
   0x9   :  { %p190_p4 = pnand %p189_p3, %p183_p0 }
   0xb   :  { %193 = shalt.err (!%p190_p4)
}
   0xc   :  { %s241_s15 = smov 64   ;;  %s242_s16 = smov 4  }
   0xd   :  { %22 = dma.hbm_to_vmem [thread:$0]  %s286_s0, 128, %s17_s13, [#allocation3], %s241_s15, %s241_s15, %s242_s16  }
   0xe   :  { %s243_s19 = smov [#allocation5]  }
   0xf   :  { %s28_s20 = sshll.u32 %s243_s19, 4  ;;  %s29_s20 = int_to_ptr.vmem [resolvable:$true] %s28_s20 }
  0x10   :  { %s202_s21 = scalar_lea.vmem %s29_s20, 256  ;;  %p207_p6 = scmp.lt.s32.totalorder %s29_s20, %s29_s20 }
  0x11   :  { %p203_p5 = scmp.ne.s32.totalorder %s29_s20, %s202_s21  ;;  %p208_p7 = scmp.lt.s32.totalorder %s202_s21, %s202_s21 }
  0x13   :  { %p209_p8 = por %p208_p7, %p207_p6 }
  0x15   :  { %p210_p9 = pnand %p209_p8, %p203_p5 }
  0x17   :  { %213 = shalt.err (!%p210_p9)
}
  0x18   :  { %s244_s22 = smov 128   ;;  %s245_s23 = smov 8  }
  0x19   :  { %34 = dma.hbm_to_vmem [thread:$0]  %s287_s1, 256, %s29_s20, [#allocation6], %s244_s22, %s244_s22, %s245_s23  }
  0x1a   :  { %234 = dma.done.wait [#allocation3], 128  }
  0x1b   :  { %235 = vsyncadd [#allocation3], 4294967168 }
  0x1c   :  { %236 = dma.done.wait [#allocation6], 256  }
  0x1d   :  { %237 = vsyncadd [#allocation6], 4294967040  ;;  %v246_v0 = vmov 0   ;;  %v170_v1 = vld [vmem:[#allocation5 + $0x4] ss:$8 sps:$4 sm:$0xff]   ;;  %v173_v3 = vld [vmem:[#allocation2] sm:$0xff]   ;;  %v50_v4 = vlaneseq }
  0x1e   :  { %111 = vmatprep.mubr.bf16.mxu0 %v246_v0  ;;  %v172_v2 = vld [vmem:[#allocation5] ss:$8 sps:$4 sm:$0xff]   ;;  %93 = vmatprep.subr.bf16.mxu0 %v170_v1  ;;  %vm75_vm0 = vcmask 130048   ;;  %v48_v8 = vld [vmem:[%s288_s2] sm:$0x3]  ;;  %s247_s1 = smov [#allocation7]  }
  0x1f   :  { %94 = vmatpush1.bf16.msra.mxu0 %v172_v2  ;;  %v51_v5 = vshrl.u32 %v50_v4, 7  ;;  %s141_s27 = sshll.u32 %s247_s1, 4  ;;  %s142_s27 = int_to_ptr.vmem [resolvable:$true] %s141_s27 }
  0x20   :  { %s214_s28 = scalar_lea.vmem %s142_s27, 256  ;;  %p219_p11 = scmp.lt.s32.totalorder %s142_s27, %s142_s27 }
  0x21   :  { %v52_v6 = vsub.s32 0, %v51_v5  ;;  %v56_v7 = vsub.s32 1, %v51_v5  ;;  %p215_p10 = scmp.ne.s32.totalorder %s142_s27, %s214_s28  ;;  %p220_p12 = scmp.lt.s32.totalorder %s214_s28, %s214_s28 }
  0x22   :  { %157 = vmatmul.mubr.msk.bf16.vlgmr.msra.gmra.mxu0 %vm75_vm0, %v173_v3 }
  0x23   :  { %v53_v9 = vrot.slane %v48_v8, %v52_v6  ;;  %v57_v10 = vrot.slane %v48_v8, %v56_v7  ;;  %p221_p13 = por %p220_p12, %p219_p11 }
  0x25   :  { %p222_p0 = pnand %p221_p13, %p215_p10 }
  0xe2   :  { %v113_v11 = vpop.f32.mrf.mxu0 }
  0xe3   :  { %v114_v13 = vadd.f32 %v113_v11, %v53_v9 }
  0xe4   :  { %v115_v12 = vpop.f32.mrf.mxu0 }
  0xe5   :  { %v116_v14 = vadd.f32 %v115_v12, %v57_v10 }
  0xe6   :  { %v117_v15 = vpop.f32.mrf.mxu0 }
  0xe7   :  { %v160_v16 = vpack.c.bf16 %v116_v14, %v114_v13  ;;  %v118_v18 = vadd.f32 %v117_v15, %v53_v9 }
  0xe8   :  { %v119_v17 = vpop.f32.mrf.mxu0 }
  0xe9   :  { %134 = vst [vmem:[#allocation7] sm:$0xff] %v160_v16  ;;  %v120_v19 = vadd.f32 %v119_v17, %v57_v10 }
  0xeb   :  { %v161_v20 = vpack.c.bf16 %v120_v19, %v118_v18 }
  0xed   :  { %135 = vst [vmem:[#allocation7 + $0x8] sm:$0xff] %v161_v20 }
  0xee   :  { %225 = shalt.err (!%p222_p0)
}
  0xef   :  { %147 = dma.vmem_to_hbm [thread:$0]  %s142_s27, 256, %s289_s3, [#allocation4], %s244_s22, %s244_s22, %s245_s23  }
  0xf0   :  { %238 = dma.done.wait [#allocation4], 256  }
  0xf1   :  { %239 = vsyncadd [#allocation4], 4294967040 }
  0xf2   :  { %151 = vsyncpa [#allocation3], 1 }
  0xf3   :  { %152 = vsyncpa [#allocation6], 1 }
  0xf4   :  { %153 = vsyncpa [#allocation4], 1 }

</bundles_post_ra>
